<compile_context>
chip_gen: v6e
topology: v6e:2x2x1
jax: 0.10.0
libtpu: 0.0.40
codegen_flags: <defaults>
</compile_context>

<pallas_src>
import jax
import jax.numpy as jnp
from jax.experimental import pallas as pl
from jax.experimental.pallas import tpu as pltpu

OUT_PAD = 128  # lane-dense output width (real outputs are the first 4 columns)


def _round_up(n, m):
    return ((n + m - 1) // m) * m


def polarnet_kernel(x_ref, w1_ref, b1_ref, w2_ref, b2_ref, w3_ref, b3_ref, o_ref):
    x = x_ref[...]          # (bt, 3)   f32
    w1 = w1_ref[...]        # (3, 64)   f32

    # fc1 on the VPU: K=3 would waste the MXU.
    h1 = (x[:, 0:1] * w1[0:1, :]
          + x[:, 1:2] * w1[1:2, :]
          + x[:, 2:3] * w1[2:3, :]
          + b1_ref[...])
    h1 = jnp.maximum(h1, 0.0)                                    # (bt, 64)  f32

    # fc2 on the MXU: bf16 operands, f32 accumulation, f32 bias add.
    h2 = jnp.dot(h1.astype(jnp.bfloat16), w2_ref[...],
                 preferred_element_type=jnp.float32) + b2_ref[...]
    h2 = jnp.maximum(h2, 0.0)                                    # (bt, 128) f32

    # fc3 on the MXU (output padded to 128 lanes -> unmasked lane-dense stores).
    o_ref[...] = jnp.dot(h2.astype(jnp.bfloat16), w3_ref[...],
                         preferred_element_type=jnp.float32) + b3_ref[...]


def polarnet_forward(x, params, *, batch_tile=1024):
    """x: (N, 3) float. params: w1,b1,w2,b2,w3,b3 stored as (in, out) / (1, out)."""
    N, F = x.shape
    assert F == 3

    # Weight preparation (cheap; folds under jit).
    w1 = params["w1"].astype(jnp.float32)            # (3, 64)  stays f32 for the VPU path
    b1 = params["b1"].astype(jnp.float32)            # (1, 64)
    w2 = params["w2"].astype(jnp.bfloat16)           # (64, 128)
    b2 = params["b2"].astype(jnp.float32)            # (1, 128)
    # Zero-pad fc3 to 128 output lanes; wrapper slices [:, :4] after the call.
    w3p = (jnp.zeros((128, OUT_PAD), jnp.float32)
           .at[:, :4].set(params["w3"].astype(jnp.float32))
           .astype(jnp.bfloat16))
    b3p = jnp.zeros((1, OUT_PAD), jnp.float32).at[:, :4].set(
        params["b3"].astype(jnp.float32))

    # Batch tiling: clamp for small batches, keep a multiple of 8 (sublane),
    # and pad N so the grid divides evenly (tail tile handled by padding).
    bt = _round_up(min(batch_tile, _round_up(N, 8)), 8)
    Np = _round_up(N, bt)
    xp = x.astype(jnp.float32)
    if Np != N:
        xp = jnp.pad(xp, ((0, Np - N), (0, 0)))

    grid = (Np // bt,)
    full = lambda a: pl.BlockSpec(a.shape, lambda i: (0, 0))

    out = pl.pallas_call(
        polarnet_kernel,
        out_shape=jax.ShapeDtypeStruct((Np, OUT_PAD), jnp.float32),
        grid_spec=pltpu.PrefetchScalarGridSpec(
            num_scalar_prefetch=0,
            grid=grid,
            in_specs=[
                pl.BlockSpec((bt, 3), lambda i: (i, 0)),   # x batch tile
                full(w1), full(b1),
                full(w2), full(b2),
                full(w3p), full(b3p),
            ],
            out_specs=pl.BlockSpec((bt, OUT_PAD), lambda i: (i, 0)),
        ),
        compiler_params=pltpu.CompilerParams(
            # Parallel batch axis lets Mosaic shard tiles across the 2 TCs on v7x.
            dimension_semantics=("parallel",),
        ),
    )(xp, w1, b1, w2, b2, w3p, b3p)

    return out[:N, :4]


def init_params(key):
    """Deterministic init mimicking PyTorch's default Linear init (uniform +-1/sqrt(fan_in))."""
    keys = jax.random.split(key, 6)

    def linear(kw, kb, fan_in, fan_out):
        bound = 1.0 / jnp.sqrt(float(fan_in))
        w = jax.random.uniform(kw, (fan_in, fan_out), jnp.float32, -bound, bound)
        b = jax.random.uniform(kb, (1, fan_out), jnp.float32, -bound, bound)
        return w, b

    w1, b1 = linear(keys[0], keys[1], 3, 64)
    w2, b2 = linear(keys[2], keys[3], 64, 128)
    w3, b3 = linear(keys[4], keys[5], 128, 4)
    return {"w1": w1, "b1": b1, "w2": w2, "b2": b2, "w3": w3, "b3": b3}


def reference_forward(x, p):
    h1 = jnp.maximum(x @ p["w1"] + p["b1"], 0.0)
    h2 = jnp.maximum(h1 @ p["w2"] + p["b2"], 0.0)
    return h2 @ p["w3"] + p["b3"]


if __name__ == "__main__":
    key = jax.random.PRNGKey(0)
    k_params, k_x = jax.random.split(key)

    params = init_params(k_params)
    # Small batch of polar-coordinate features (N, 3); N deliberately not a
    # multiple of 8 / the tile to exercise the tail-padding path.
    N = 100
    x = jax.random.normal(k_x, (N, 3), jnp.float32)

    out = jax.block_until_ready(polarnet_forward(x, params))
    ref = reference_forward(x, params)

    assert out.shape == (N, 4)
    # bf16 MXU matmuls -> loosened tolerance vs the pure-f32 reference.
    assert jnp.allclose(out, ref, atol=5e-2, rtol=5e-2), "mismatch vs pure-JAX reference"
    print("KERNEL_OK")
</pallas_src>

<mosaic_0001>
module attributes {stable_mosaic.version = 11 : i64} {
  func.func @polarnet_kernel(%arg0: i32, %arg1: memref<104x3xf32, #tpu.memory_space<vmem>>, %arg2: memref<3x64xf32, #tpu.memory_space<vmem>>, %arg3: memref<1x64xf32, #tpu.memory_space<vmem>>, %arg4: memref<64x128xbf16, #tpu.memory_space<vmem>>, %arg5: memref<1x128xf32, #tpu.memory_space<vmem>>, %arg6: memref<128x128xbf16, #tpu.memory_space<vmem>>, %arg7: memref<1x128xf32, #tpu.memory_space<vmem>>, %arg8: memref<104x128xf32, #tpu.memory_space<vmem>>) attributes {dimension_semantics = [#tpu.dimension_semantics<parallel>], iteration_bounds = array<i64: 1>, scalar_prefetch = 0 : i64, scratch_operands = 0 : i64, tpu.core_type = #tpu.core_type<tc>, window_params = [{transform_indices = @transform_0, window_bounds = array<i64: 104, 3>}, {pipeline_mode = #tpu.pipeline_mode<synchronous>, transform_indices = @transform_1, window_bounds = array<i64: 3, 64>}, {pipeline_mode = #tpu.pipeline_mode<synchronous>, transform_indices = @transform_2, window_bounds = array<i64: 1, 64>}, {pipeline_mode = #tpu.pipeline_mode<synchronous>, transform_indices = @transform_3, window_bounds = array<i64: 64, 128>}, {pipeline_mode = #tpu.pipeline_mode<synchronous>, transform_indices = @transform_4, window_bounds = array<i64: 1, 128>}, {pipeline_mode = #tpu.pipeline_mode<synchronous>, transform_indices = @transform_5, window_bounds = array<i64: 128, 128>}, {pipeline_mode = #tpu.pipeline_mode<synchronous>, transform_indices = @transform_6, window_bounds = array<i64: 1, 128>}, {transform_indices = @transform_7, window_bounds = array<i64: 104, 128>}]} {
    %c0 = arith.constant 0 : index
    %c0_0 = arith.constant 0 : index
    %0 = vector.load %arg1[%c0, %c0_0] : memref<104x3xf32, #tpu.memory_space<vmem>>, vector<104x3xf32>
    %c0_1 = arith.constant 0 : index
    %c0_2 = arith.constant 0 : index
    %1 = vector.load %arg2[%c0_1, %c0_2] : memref<3x64xf32, #tpu.memory_space<vmem>>, vector<3x64xf32>
    %2 = vector.extract_strided_slice %0 {offsets = [0, 0], sizes = [104, 1], strides = [1, 1]} : vector<104x3xf32> to vector<104x1xf32>
    %3 = vector.extract_strided_slice %1 {offsets = [0, 0], sizes = [1, 64], strides = [1, 1]} : vector<3x64xf32> to vector<1x64xf32>
    %4 = vector.broadcast %2 : vector<104x1xf32> to vector<104x64xf32>
    %5 = vector.broadcast %3 : vector<1x64xf32> to vector<104x64xf32>
    %6 = arith.mulf %4, %5 : vector<104x64xf32>
    %7 = vector.extract_strided_slice %0 {offsets = [0, 1], sizes = [104, 1], strides = [1, 1]} : vector<104x3xf32> to vector<104x1xf32>
    %8 = vector.extract_strided_slice %1 {offsets = [1, 0], sizes = [1, 64], strides = [1, 1]} : vector<3x64xf32> to vector<1x64xf32>
    %9 = vector.broadcast %7 : vector<104x1xf32> to vector<104x64xf32>
    %10 = vector.broadcast %8 : vector<1x64xf32> to vector<104x64xf32>
    %11 = arith.mulf %9, %10 : vector<104x64xf32>
    %12 = arith.addf %6, %11 : vector<104x64xf32>
    %13 = vector.extract_strided_slice %0 {offsets = [0, 2], sizes = [104, 1], strides = [1, 1]} : vector<104x3xf32> to vector<104x1xf32>
    %14 = vector.extract_strided_slice %1 {offsets = [2, 0], sizes = [1, 64], strides = [1, 1]} : vector<3x64xf32> to vector<1x64xf32>
    %15 = vector.broadcast %13 : vector<104x1xf32> to vector<104x64xf32>
    %16 = vector.broadcast %14 : vector<1x64xf32> to vector<104x64xf32>
    %17 = arith.mulf %15, %16 : vector<104x64xf32>
    %18 = arith.addf %12, %17 : vector<104x64xf32>
    %c0_3 = arith.constant 0 : index
    %c0_4 = arith.constant 0 : index
    %19 = vector.load %arg3[%c0_3, %c0_4] : memref<1x64xf32, #tpu.memory_space<vmem>>, vector<1x64xf32>
    %20 = vector.broadcast %19 : vector<1x64xf32> to vector<104x64xf32>
    %21 = arith.addf %18, %20 : vector<104x64xf32>
    %cst = arith.constant 0.000000e+00 : f32
    %22 = vector.broadcast %cst : f32 to vector<104x64xf32>
    %23 = arith.maximumf %21, %22 : vector<104x64xf32>
    %24 = arith.truncf %23 : vector<104x64xf32> to vector<104x64xbf16>
    %c0_5 = arith.constant 0 : index
    %c0_6 = arith.constant 0 : index
    %25 = vector.load %arg4[%c0_5, %c0_6] : memref<64x128xbf16, #tpu.memory_space<vmem>>, vector<64x128xbf16>
    %cst_7 = arith.constant dense<0.000000e+00> : vector<104x128xf32>
    %26 = tpu.matmul %24, %25, %cst_7 {dimension_numbers = #tpu.dot_dimension_numbers<[1], [0], [0], [1], [0, 0, 1, 1], [], []>} : vector<104x64xbf16>, vector<64x128xbf16>, vector<104x128xf32> -> vector<104x128xf32>
    %c0_8 = arith.constant 0 : index
    %c0_9 = arith.constant 0 : index
    %27 = vector.load %arg5[%c0_8, %c0_9] : memref<1x128xf32, #tpu.memory_space<vmem>>, vector<1x128xf32>
    %28 = vector.broadcast %27 : vector<1x128xf32> to vector<104x128xf32>
    %29 = arith.addf %26, %28 : vector<104x128xf32>
    %cst_10 = arith.constant 0.000000e+00 : f32
    %30 = vector.broadcast %cst_10 : f32 to vector<104x128xf32>
    %31 = arith.maximumf %29, %30 : vector<104x128xf32>
    %32 = arith.truncf %31 : vector<104x128xf32> to vector<104x128xbf16>
    %c0_11 = arith.constant 0 : index
    %c0_12 = arith.constant 0 : index
    %33 = vector.load %arg6[%c0_11, %c0_12] : memref<128x128xbf16, #tpu.memory_space<vmem>>, vector<128x128xbf16>
    %cst_13 = arith.constant dense<0.000000e+00> : vector<104x128xf32>
    %34 = tpu.matmul %32, %33, %cst_13 {dimension_numbers = #tpu.dot_dimension_numbers<[1], [0], [0], [1], [0, 0, 1, 1], [], []>} : vector<104x128xbf16>, vector<128x128xbf16>, vector<104x128xf32> -> vector<104x128xf32>
    %c0_14 = arith.constant 0 : index
    %c0_15 = arith.constant 0 : index
    %35 = vector.load %arg7[%c0_14, %c0_15] : memref<1x128xf32, #tpu.memory_space<vmem>>, vector<1x128xf32>
    %36 = vector.broadcast %35 : vector<1x128xf32> to vector<104x128xf32>
    %37 = arith.addf %34, %36 : vector<104x128xf32>
    %c0_16 = arith.constant 0 : index
    %c0_17 = arith.constant 0 : index
    %38 = vector.load %arg8[%c0_16, %c0_17] : memref<104x128xf32, #tpu.memory_space<vmem>>, vector<104x128xf32>
    tpu.vector_store %arg8[%c0_16, %c0_17], %37 {strides = array<i32>} : memref<104x128xf32, #tpu.memory_space<vmem>>, vector<104x128xf32>,
    return
  }
  func.func @transform_0(%arg0: i32) -> (i32, i32) {
    %c0_i32 = arith.constant 0 : i32
    %c0_i32_0 = arith.constant 0 : i32
    return %arg0, %c0_i32 : i32, i32
  }
  func.func @transform_1(%arg0: i32) -> (i32, i32) {
    %c0_i32 = arith.constant 0 : i32
    %c0_i32_0 = arith.constant 0 : i32
    %c0_i32_1 = arith.constant 0 : i32
    return %c0_i32, %c0_i32_0 : i32, i32
  }
  func.func @transform_2(%arg0: i32) -> (i32, i32) {
    %c0_i32 = arith.constant 0 : i32
    %c0_i32_0 = arith.constant 0 : i32
    %c0_i32_1 = arith.constant 0 : i32
    return %c0_i32, %c0_i32_0 : i32, i32
  }
  func.func @transform_3(%arg0: i32) -> (i32, i32) {
    %c0_i32 = arith.constant 0 : i32
    %c0_i32_0 = arith.constant 0 : i32
    %c0_i32_1 = arith.constant 0 : i32
    return %c0_i32, %c0_i32_0 : i32, i32
  }
  func.func @transform_4(%arg0: i32) -> (i32, i32) {
    %c0_i32 = arith.constant 0 : i32
    %c0_i32_0 = arith.constant 0 : i32
    %c0_i32_1 = arith.constant 0 : i32
    return %c0_i32, %c0_i32_0 : i32, i32
  }
  func.func @transform_5(%arg0: i32) -> (i32, i32) {
    %c0_i32 = arith.constant 0 : i32
    %c0_i32_0 = arith.constant 0 : i32
    %c0_i32_1 = arith.constant 0 : i32
    return %c0_i32, %c0_i32_0 : i32, i32
  }
  func.func @transform_6(%arg0: i32) -> (i32, i32) {
    %c0_i32 = arith.constant 0 : i32
    %c0_i32_0 = arith.constant 0 : i32
    %c0_i32_1 = arith.constant 0 : i32
    return %c0_i32, %c0_i32_0 : i32, i32
  }
  func.func @transform_7(%arg0: i32) -> (i32, i32) {
    %c0_i32 = arith.constant 0 : i32
    %c0_i32_0 = arith.constant 0 : i32
    return %arg0, %c0_i32 : i32, i32
  }
}

</mosaic_0001>

<bundles_post_ra>
// kernel: tpu_custom_call.1
= control target key start
LH: loop header
LB: loop body
LE: loop exit
PB: predicated region body
PF: predicated region fallthrough
CT: control target
= control target key end

     0   :  { %v897_v1 = vmov 2   ;;  %v898_v2 = vmov 1   ;;  %v899_v4 = vmov 0.0   ;;  %v900_v5 = vmov 0   ;;  %s1194_s0 = inlined_call_operand.vmem [shape: f32[104,3], index: 0, kind: input, shape index: {}]   ;;  %s1195_s1 = inlined_call_operand.vmem [shape: f32[3,64], index: 1, kind: input, shape index: {}]   ;;  %s1196_s2 = inlined_call_operand.vmem [shape: f32[1,64], index: 2, kind: input, shape index: {}]   ;;  %s1197_s3 = inlined_call_operand.vmem [shape: bf16[64,128], index: 3, kind: input, shape index: {}]   ;;  %s1198_s4 = inlined_call_operand.vmem [shape: f32[1,128], index: 4, kind: input, shape index: {}]   ;;  %s1199_s5 = inlined_call_operand.vmem [shape: bf16[128,128], index: 5, kind: input, shape index: {}]   ;;  %s1200_s6 = inlined_call_operand.vmem [shape: f32[1,128], index: 6, kind: input, shape index: {}]   ;;  %s1201_s7 = inlined_call_operand.hbm [shape: f32[104,128], index: 7, kind: output, shape index: {}]  }
   0x1   :  { %v28_v0 = vld [vmem:[%s1194_s0] sm:$0xff]  ;;  %838 = vset.pattern.permute.xlu0 %v897_v1  ;;  %837 = vset.pattern.permute.xlu1 %v898_v2  ;;  %v29_v3 = vld [vmem:[%s1194_s0 + $0x8] sm:$0xff]  ;;  %v863_v6 = vld [vmem:[%s1197_s3 + $0x18] sm:$0xff]  }
   0x2   :  { %207 = vperm.xlu0 %838, %v28_v0   ;;  %125 = vperm.xlu1 %837, %v28_v0   ;;  %v864_v7 = vld [vmem:[%s1197_s3 + $0x10] sm:$0xff]   ;;  %v31_v8 = vld [vmem:[%s1194_s0 + $0x18] sm:$0xff]  ;;  %v865_v9 = vld [vmem:[%s1197_s3 + $0x8] sm:$0xff]  }
   0x3   :  { %733 = vmatprep.subr.bf16.mxu0 %v899_v4  ;;  %813 = vmatprep.subr.bf16.mxu1 %v899_v4  ;;  %v30_v10 = vld [vmem:[%s1194_s0 + $0x10] sm:$0xff] }
   0x4   :  { %734 = vmatpush3.bf16.msra.mxu0 %v863_v6 }
   0x5   :  { %735 = vmatprep.subr.bf16.mxu0 %v899_v4 }
   0x6   :  { %839 = vset.pattern.permute.xlu0 %v900_v5  ;;  %129 = vperm.xlu1 %837, %v29_v3  }
   0x7   :  { %44 = vperm.xlu0 %839, %v28_v0  }
   0x8   :  { %736 = vmatpush3.bf16.msra.mxu0 %v864_v7 }
   0x9   :  { %737 = vmatprep.subr.bf16.mxu0 %v899_v4 }
   0xa   :  { %840 = vset.pattern.permute.xlu1 %v897_v1 }
   0xb   :  { %49 = vperm.xlu0 %839, %v29_v3   ;;  %211 = vperm.xlu1 %840, %v29_v3  }
   0xc   :  { %12 = vsyncpa [#allocation3], 0  ;;  %v33_v11 = vld [vmem:[%s1194_s0 + $0x28] sm:$0xff]  ;;  %738 = vmatpush3.bf16.msra.mxu0 %v865_v9  ;;  %v866_v12 = vld [vmem:[%s1197_s3] sm:$0xff]   ;;  %vm901_vm0 = vmmov 0   ;;  %v107_v21 = vlaneseq  ;;  %vm367_vm1 = vcmask 523264  }
   0xd   :  { %739 = vmatprep.subr.bf16.mxu0 %v899_v4  ;;  %741 = vmatprep.mubr.msk.bf16.mxu0 %vm901_vm0, %v899_v4  ;;  %v35_v13 = vld [vmem:[%s1194_s0 + $0x38] sm:$0xff]  ;;  %v32_v14 = vld [vmem:[%s1194_s0 + $0x20] sm:$0xff]  ;;  %v34_v15 = vld [vmem:[%s1194_s0 + $0x30] sm:$0xff] }
   0xe   :  { %789 = vmatprep.mubr.msk.bf16.mxu1 %vm901_vm0, %v899_v4  ;;  %v36_v16 = vld [vmem:[%s1194_s0 + $0x40] sm:$0xff]  ;;  %v37_v17 = vld [vmem:[%s1194_s0 + $0x48] sm:$0xff]  ;;  %v39_v18 = vld [vmem:[%s1194_s0 + $0x58] sm:$0xff]  ;;  %v108_v22 = vshrl.u32 %v107_v21, 7 }
   0xf   :  { %59 = vperm.xlu0 %839, %v31_v8   ;;  %841 = vset.pattern.permute.xlu1 %v900_v5  ;;  %v38_v19 = vld [vmem:[%s1194_s0 + $0x50] sm:$0xff]  ;;  %v40_v20 = vld [vmem:[%s1194_s0 + $0x60] sm:$0xff]  ;;  %v867_v23 = vld [vmem:[%s1199_s5 + $0x38] sm:$0xff]  }
  0x10   :  { %54 = vperm.xlu1 %841, %v30_v10   ;;  %740 = vmatpush3.bf16.msra.mxu0 %v866_v12  ;;  %v178_v24 = vsub.s32 1, %v108_v22  ;;  %v260_v25 = vsub.s32 2, %v108_v22  ;;  %v109_v26 = vsub.s32 0, %v108_v22  ;;  %v41_v27 = vld [vmem:[%s1195_s1] sm:$0x7]  ;;  %v868_v30 = vld [vmem:[%s1199_s5 + $0x30] sm:$0xff]  }
  0x11   :  { %769 = vmatprep.subr.bf16.mxu0 %v899_v4  ;;  %821 = vmatpush3.bf16.msra.mxu1 %v867_v23  ;;  %v869_v36 = vld [vmem:[%s1199_s5 + $0x28] sm:$0xff]   ;;  %v870_v43 = vld [vmem:[%s1199_s5 + $0x20] sm:$0xff]   ;;  %v871_v51 = vld [vmem:[%s1199_s5 + $0x18] sm:$0xff]  }
  0x12   :  { %814 = vmatprep.subr.bf16.mxu1 %v899_v4  ;;  %v1042_v31 = vrot.slane %v41_v27, %v178_v24  ;;  %v1044_v32 = vrot.slane %v41_v27, %v260_v25  ;;  %v1046_v33 = vrot.slane %v41_v27, %v109_v26  ;;  %v1064_v47 = vld [vmem:[%s1196_s2] ss:$0 sm:$0xff] }
  0x13   :  { %69 = vperm.xlu0 %839, %v33_v11  }
  0x14   :  { %842 = vset.pattern.permute.xlu1 %v898_v2 }
  0x15   :  { %133 = vperm.xlu1 %842, %v30_v10   ;;  %822 = vmatpush3.bf16.msra.mxu1 %v868_v30 }
  0x16   :  { %815 = vmatprep.subr.bf16.mxu1 %v899_v4 }
  0x17   :  { %79 = vperm.xlu0 %839, %v35_v13  }
  0x19   :  { %137 = vperm.xlu1 %842, %v31_v8   ;;  %823 = vmatpush3.bf16.msra.mxu1 %v869_v36 }
  0x1a   :  { %816 = vmatprep.subr.bf16.mxu1 %v899_v4 }
  0x1b   :  { %848 = vset.pattern.permute.xlu0 %v897_v1 }
  0x1c   :  { %215 = vperm.xlu0 %848, %v30_v10  }
  0x1d   :  { %843 = vset.pattern.permute.xlu1 %v897_v1  ;;  %824 = vmatpush3.bf16.msra.mxu1 %v870_v43 }
  0x1e   :  { %219 = vperm.xlu1 %843, %v31_v8   ;;  %817 = vmatprep.subr.bf16.mxu1 %v899_v4 }
  0x20   :  { %223 = vperm.xlu0 %848, %v32_v14  }
  0x21   :  { %825 = vmatpush3.bf16.msra.mxu1 %v871_v51 }
  0x22   :  { %844 = vset.pattern.permute.xlu1 %v900_v5  ;;  %818 = vmatprep.subr.bf16.mxu1 %v899_v4 }
  0x23   :  { %64 = vperm.xlu1 %844, %v32_v14  }
  0x24   :  { %231 = vperm.xlu0 %848, %v34_v15  }
  0x27   :  { %845 = vset.pattern.permute.xlu1 %v898_v2 }
  0x28   :  { %141 = vperm.xlu1 %845, %v32_v14   ;;  %239 = vperm.xlu0 %848, %v36_v16  }
  0x2c   :  { %145 = vperm.xlu1 %845, %v33_v11   ;;  %853 = vset.pattern.permute.xlu0 %v900_v5 }
  0x2d   :  { %89 = vperm.xlu0 %853, %v37_v17  }
  0x30   :  { %846 = vset.pattern.permute.xlu1 %v897_v1 }
  0x31   :  { %227 = vperm.xlu1 %846, %v33_v11   ;;  %99 = vperm.xlu0 %853, %v39_v18  }
  0x35   :  { %847 = vset.pattern.permute.xlu1 %v900_v5  ;;  %857 = vset.pattern.permute.xlu0 %v897_v1 }
  0x36   :  { %74 = vperm.xlu1 %847, %v34_v15   ;;  %247 = vperm.xlu0 %857, %v38_v19  }
  0x3a   :  { %849 = vset.pattern.permute.xlu1 %v898_v2  ;;  %860 = vset.pattern.permute.xlu0 %v898_v2 }
  0x3b   :  { %149 = vperm.xlu1 %849, %v34_v15   ;;  %173 = vperm.xlu0 %860, %v40_v20  }
  0x3f   :  { %153 = vperm.xlu1 %849, %v35_v13   ;;  %862 = vset.pattern.permute.xlu0 %v897_v1 }
  0x43   :  { %850 = vset.pattern.permute.xlu1 %v897_v1 }
  0x44   :  { %235 = vperm.xlu1 %850, %v35_v13  }
  0x48   :  { %851 = vset.pattern.permute.xlu1 %v900_v5 }
  0x49   :  { %84 = vperm.xlu1 %851, %v36_v16  }
  0x4d   :  { %852 = vset.pattern.permute.xlu1 %v898_v2 }
  0x4e   :  { %157 = vperm.xlu1 %852, %v36_v16  }
  0x52   :  { %161 = vperm.xlu1 %852, %v37_v17  }
  0x56   :  { %854 = vset.pattern.permute.xlu1 %v897_v1 }
  0x57   :  { %243 = vperm.xlu1 %854, %v37_v17  }
  0x5b   :  { %855 = vset.pattern.permute.xlu1 %v900_v5 }
  0x5c   :  { %94 = vperm.xlu1 %855, %v38_v19  }
  0x60   :  { %856 = vset.pattern.permute.xlu1 %v898_v2 }
  0x61   :  { %165 = vperm.xlu1 %856, %v38_v19  }
  0x65   :  { %169 = vperm.xlu1 %856, %v39_v18  }
  0x69   :  { %858 = vset.pattern.permute.xlu1 %v897_v1 }
  0x6a   :  { %251 = vperm.xlu1 %858, %v39_v18  }
  0x6e   :  { %859 = vset.pattern.permute.xlu1 %v900_v5 }
  0x6f   :  { %104 = vperm.xlu1 %859, %v40_v20  }
  0x73   :  { %861 = vset.pattern.permute.xlu1 %v897_v1 }
  0x74   :  { %255 = vperm.xlu1 %861, %v40_v20  }
  0x7d   :  { %v126_v28 = vpop.permute.xlu1 %125  ;;  %v208_v29 = vpop.permute.xlu0 %207 }
  0x7e   :  { %v180_v37 = vmul.f32 %v1042_v31, %v126_v28  ;;  %v262_v38 = vmul.f32 %v1044_v32, %v208_v29 }
  0x81   :  { %v130_v34 = vpop.permute.xlu1 %129 }
  0x82   :  { %v45_v35 = vpop.permute.xlu0 %44  ;;  %v181_v44 = vmul.f32 %v1042_v31, %v130_v34 }
  0x83   :  { %v111_v39 = vmul.f32 %v1046_v33, %v45_v35 }
  0x85   :  { %v193_v40 = vadd.f32 %v180_v37, %v111_v39 }
  0x86   :  { %v50_v41 = vpop.permute.xlu0 %49  ;;  %v212_v42 = vpop.permute.xlu1 %211 }
  0x87   :  { %v275_v45 = vadd.f32 %v262_v38, %v193_v40  ;;  %v112_v46 = vmul.f32 %v1046_v33, %v50_v41  ;;  %v263_v49 = vmul.f32 %v1044_v32, %v212_v42 }
  0x89   :  { %v194_v48 = vadd.f32 %v181_v44, %v112_v46  ;;  %v295_v52 = vadd.f32 %v1064_v47, %v275_v45 }
  0x8a   :  { %v60_v50 = vpop.permute.xlu0 %59 }
  0x8b   :  { %v276_v53 = vadd.f32 %v263_v49, %v194_v48  ;;  %v55_v54 = vpop.permute.xlu1 %54  ;;  %v308_v57 = vmax.f32 %v295_v52, 0.0  ;;  %v114_v0 = vmul.f32 %v1046_v33, %v60_v50 }
  0x8c   :  { %v113_v1 = vmul.f32 %v1046_v33, %v55_v54 }
  0x8d   :  { %v296_v55 = vadd.f32 %v1064_v47, %v276_v53 }
  0x8e   :  { %v70_v56 = vpop.permute.xlu0 %69 }
  0x8f   :  { %v309_v58 = vmax.f32 %v296_v55, 0.0  ;;  %v116_v25 = vmul.f32 %v1046_v33, %v70_v56 }
  0x90   :  { %v134_v59 = vpop.permute.xlu1 %133 }
  0x91   :  { %v321_v60 = vpack.c.bf16 %v309_v58, %v308_v57  ;;  %v182_v62 = vmul.f32 %v1042_v31, %v134_v59 }
  0x92   :  { %v1074_v61 = vpop.permute.xlu0 %79 }
  0x93   :  { %742 = vmatmul.mubr.msk.bf16.vlgmr.msra.gmra.mxu0 %vm367_vm1, %v321_v60  ;;  %v195_v5 = vadd.f32 %v182_v62, %v113_v1  ;;  %v118_v50 = vmul.f32 %v1046_v33, %v1074_v61 }
  0x94   :  { %v138_v63 = vpop.permute.xlu1 %137  ;;  %745 = vmatprep.mubr.msk.bf16.mxu0 %vm901_vm0, %v899_v4  ;;  %770 = vmatpush3.bf16.msra.mxu0 %v867_v23 }
  0x95   :  { %771 = vmatprep.subr.bf16.mxu0 %v899_v4  ;;  %v183_v2 = vmul.f32 %v1042_v31, %v138_v63 }
  0x97   :  { %v216_v3 = vpop.permute.xlu0 %215  ;;  %v196_v8 = vadd.f32 %v183_v2, %v114_v0 }
  0x98   :  { %v264_v6 = vmul.f32 %v1044_v32, %v216_v3  ;;  %772 = vmatpush3.bf16.msra.mxu0 %v868_v30 }
  0x99   :  { %v220_v7 = vpop.permute.xlu1 %219  ;;  %773 = vmatprep.subr.bf16.mxu0 %v899_v4 }
  0x9a   :  { %v277_v9 = vadd.f32 %v264_v6, %v195_v5  ;;  %v265_v10 = vmul.f32 %v1044_v32, %v220_v7 }
  0x9b   :  { %v224_v20 = vpop.permute.xlu0 %223 }
  0x9c   :  { %v297_v11 = vadd.f32 %v1064_v47, %v277_v9  ;;  %v278_v12 = vadd.f32 %v265_v10, %v196_v8  ;;  %774 = vmatpush3.bf16.msra.mxu0 %v869_v36  ;;  %v266_v23 = vmul.f32 %v1044_v32, %v224_v20  ;;  %v872_v10 = vld [vmem:[%s1199_s5 + $0x10] sm:$0xff]  }
  0x9d   :  { %775 = vmatprep.subr.bf16.mxu0 %v899_v4  ;;  %826 = vmatpush3.bf16.msra.mxu1 %v872_v10 }
  0x9e   :  { %v298_v13 = vadd.f32 %v1064_v47, %v278_v12  ;;  %v65_v14 = vpop.permute.xlu1 %64  ;;  %v310_v15 = vmax.f32 %v297_v11, 0.0  ;;  %819 = vmatprep.subr.bf16.mxu1 %v899_v4 }
  0x9f   :  { %v115_v21 = vmul.f32 %v1046_v33, %v65_v14 }
  0xa0   :  { %v311_v16 = vmax.f32 %v298_v13, 0.0  ;;  %776 = vmatpush3.bf16.msra.mxu0 %v870_v43  ;;  %v232_v43 = vpop.permute.xlu0 %231 }
  0xa1   :  { %777 = vmatprep.subr.bf16.mxu0 %v899_v4  ;;  %v268_v46 = vmul.f32 %v1044_v32, %v232_v43 }
  0xa2   :  { %v322_v17 = vpack.c.bf16 %v311_v16, %v310_v15  ;;  %v873_v16 = vld [vmem:[%s1199_s5 + $0x8] sm:$0xff]  }
  0xa3   :  { %v142_v18 = vpop.permute.xlu1 %141  ;;  %827 = vmatpush3.bf16.msra.mxu1 %v873_v16 }
  0xa4   :  { %v184_v19 = vmul.f32 %v1042_v31, %v142_v18  ;;  %746 = vmatmul.mubr.msk.bf16.gmra.mxu0 %vm367_vm1, %v322_v17  ;;  %v240_v63 = vpop.permute.xlu0 %239  ;;  %820 = vmatprep.subr.bf16.mxu1 %v899_v4 }
  0xa5   :  { %749 = vmatprep.mubr.msk.bf16.mxu0 %vm901_vm0, %v899_v4  ;;  %778 = vmatpush3.bf16.msra.mxu0 %v871_v51  ;;  %v270_v6 = vmul.f32 %v1044_v32, %v240_v63 }
  0xa6   :  { %779 = vmatprep.subr.bf16.mxu0 %v899_v4  ;;  %v197_v22 = vadd.f32 %v184_v19, %v115_v21 }
  0xa7   :  { %v146_v24 = vpop.permute.xlu1 %145 }
  0xa8   :  { %v185_v26 = vmul.f32 %v1042_v31, %v146_v24  ;;  %v279_v27 = vadd.f32 %v266_v23, %v197_v22  ;;  %v90_v2 = vpop.permute.xlu0 %89  ;;  %v874_v22 = vld [vmem:[%s1199_s5] sm:$0xff]  }
  0xa9   :  { %v120_v7 = vmul.f32 %v1046_v33, %v90_v2  ;;  %780 = vmatpush3.bf16.msra.mxu0 %v872_v10  ;;  %828 = vmatpush3.bf16.msra.mxu1 %v874_v22 }
  0xaa   :  { %v198_v29 = vadd.f32 %v185_v26, %v116_v25  ;;  %v299_v34 = vadd.f32 %v1064_v47, %v279_v27  ;;  %781 = vmatprep.subr.bf16.mxu0 %v899_v4 }
  0xac   :  { %v228_v28 = vpop.permute.xlu1 %227  ;;  %v312_v38 = vmax.f32 %v299_v34, 0.0  ;;  %v100_v19 = vpop.permute.xlu0 %99 }
  0xad   :  { %v267_v30 = vmul.f32 %v1044_v32, %v228_v28  ;;  %782 = vmatpush3.bf16.msra.mxu0 %v873_v16 }
  0xae   :  { %783 = vmatprep.subr.bf16.mxu0 %v899_v4 }
  0xaf   :  { %v280_v35 = vadd.f32 %v267_v30, %v198_v29 }
  0xb1   :  { %v300_v36 = vadd.f32 %v1064_v47, %v280_v35  ;;  %v75_v37 = vpop.permute.xlu1 %74  ;;  %784 = vmatpush3.bf16.msra.mxu0 %v874_v22  ;;  %v248_v26 = vpop.permute.xlu0 %247  ;;  %v122_v35 = vmul.f32 %v1046_v33, %v100_v19 }
  0xb2   :  { %v117_v44 = vmul.f32 %v1046_v33, %v75_v37  ;;  %v272_v29 = vmul.f32 %v1044_v32, %v248_v26 }
  0xb3   :  { %v313_v39 = vmax.f32 %v300_v36, 0.0 }
  0xb5   :  { %v323_v40 = vpack.c.bf16 %v313_v39, %v312_v38 }
  0xb6   :  { %v150_v41 = vpop.permute.xlu1 %149 }
  0xb7   :  { %v186_v42 = vmul.f32 %v1042_v31, %v150_v41  ;;  %750 = vmatmul.mubr.msk.bf16.gmra.mxu0 %vm367_vm1, %v323_v40  ;;  %v174_v40 = vpop.permute.xlu0 %173 }
  0xb8   :  { %753 = vmatprep.mubr.msk.bf16.mxu0 %vm901_vm0, %v899_v4 }
  0xb9   :  { %v199_v45 = vadd.f32 %v186_v42, %v117_v44 }
  0xba   :  { %v154_v48 = vpop.permute.xlu1 %153 }
  0xbb   :  { %v187_v49 = vmul.f32 %v1042_v31, %v154_v48  ;;  %v281_v51 = vadd.f32 %v268_v46, %v199_v45  ;;  %v192_v45 = vmul.f32 %v1042_v31, %v174_v40 }
  0xbd   :  { %v200_v53 = vadd.f32 %v187_v49, %v118_v50  ;;  %v301_v55 = vadd.f32 %v1064_v47, %v281_v51 }
  0xbf   :  { %v236_v52 = vpop.permute.xlu1 %235  ;;  %v314_v59 = vmax.f32 %v301_v55, 0.0 }
  0xc0   :  { %v269_v54 = vmul.f32 %v1044_v32, %v236_v52 }
  0xc2   :  { %v282_v56 = vadd.f32 %v269_v54, %v200_v53 }
  0xc4   :  { %v302_v57 = vadd.f32 %v1064_v47, %v282_v56  ;;  %v85_v58 = vpop.permute.xlu1 %84 }
  0xc5   :  { %v119_v61 = vmul.f32 %v1046_v33, %v85_v58 }
  0xc6   :  { %v315_v60 = vmax.f32 %v302_v57, 0.0 }
  0xc8   :  { %v324_v62 = vpack.c.bf16 %v315_v60, %v314_v59 }
  0xc9   :  { %v158_v0 = vpop.permute.xlu1 %157 }
  0xca   :  { %v188_v1 = vmul.f32 %v1042_v31, %v158_v0  ;;  %754 = vmatmul.mubr.msk.bf16.gmra.mxu0 %vm367_vm1, %v324_v62 }
  0xcb   :  { %757 = vmatprep.mubr.msk.bf16.mxu0 %vm901_vm0, %v899_v4 }
  0xcc   :  { %v201_v3 = vadd.f32 %v188_v1, %v119_v61 }
  0xcd   :  { %v162_v5 = vpop.permute.xlu1 %161 }
  0xce   :  { %v189_v8 = vmul.f32 %v1042_v31, %v162_v5  ;;  %v283_v9 = vadd.f32 %v270_v6, %v201_v3 }
  0xd0   :  { %v202_v12 = vadd.f32 %v189_v8, %v120_v7  ;;  %v303_v14 = vadd.f32 %v1064_v47, %v283_v9 }
  0xd2   :  { %v244_v11 = vpop.permute.xlu1 %243  ;;  %v316_v20 = vmax.f32 %v303_v14, 0.0 }
  0xd3   :  { %v271_v13 = vmul.f32 %v1044_v32, %v244_v11 }
  0xd5   :  { %v284_v15 = vadd.f32 %v271_v13, %v202_v12 }
  0xd7   :  { %v304_v17 = vadd.f32 %v1064_v47, %v284_v15  ;;  %v95_v18 = vpop.permute.xlu1 %94 }
  0xd8   :  { %v121_v27 = vmul.f32 %v1046_v33, %v95_v18 }
  0xd9   :  { %v317_v21 = vmax.f32 %v304_v17, 0.0 }
  0xdb   :  { %v325_v23 = vpack.c.bf16 %v317_v21, %v316_v20 }
  0xdc   :  { %v166_v24 = vpop.permute.xlu1 %165 }
  0xdd   :  { %v190_v25 = vmul.f32 %v1042_v31, %v166_v24  ;;  %758 = vmatmul.mubr.msk.bf16.gmra.mxu0 %vm367_vm1, %v325_v23 }
  0xde   :  { %761 = vmatprep.mubr.msk.bf16.mxu0 %vm901_vm0, %v899_v4 }
  0xdf   :  { %v203_v28 = vadd.f32 %v190_v25, %v121_v27 }
  0xe0   :  { %v170_v30 = vpop.permute.xlu1 %169 }
  0xe1   :  { %v191_v34 = vmul.f32 %v1042_v31, %v170_v30  ;;  %v285_v36 = vadd.f32 %v272_v29, %v203_v28  ;;  %v1163_v31 = vld [vmem:[%s1198_s4] ss:$0 sm:$0xff] }
  0xe3   :  { %v204_v38 = vadd.f32 %v191_v34, %v122_v35  ;;  %v305_v41 = vadd.f32 %v1064_v47, %v285_v36 }
  0xe5   :  { %v252_v37 = vpop.permute.xlu1 %251  ;;  %v318_v48 = vmax.f32 %v305_v41, 0.0 }
  0xe6   :  { %v273_v39 = vmul.f32 %v1044_v32, %v252_v37 }
  0xe8   :  { %v286_v42 = vadd.f32 %v273_v39, %v204_v38 }
  0xea   :  { %v306_v43 = vadd.f32 %v1064_v47, %v286_v42  ;;  %v105_v44 = vpop.permute.xlu1 %104 }
  0xeb   :  { %v123_v46 = vmul.f32 %v1046_v33, %v105_v44 }
  0xec   :  { %v319_v49 = vmax.f32 %v306_v43, 0.0 }
  0xed   :  { %v205_v51 = vadd.f32 %v192_v45, %v123_v46 }
  0xee   :  { %v326_v50 = vpack.c.bf16 %v319_v49, %v318_v48 }
  0xef   :  { %v256_v52 = vpop.permute.xlu1 %255 }
  0xf0   :  { %v274_v53 = vmul.f32 %v1044_v32, %v256_v52  ;;  %762 = vmatmul.mubr.msk.bf16.gmra.mxu0 %vm367_vm1, %v326_v50 }
  0xf1   :  { %765 = vmatprep.mubr.msk.bf16.mxu0 %vm901_vm0, %v899_v4 }
  0xf2   :  { %v287_v54 = vadd.f32 %v274_v53, %v205_v51 }
  0xf4   :  { %v307_v55 = vadd.f32 %v1064_v47, %v287_v54 }
  0xf6   :  { %v320_v56 = vmax.f32 %v307_v55, 0.0 }
  0xf8   :  { %v327_v57 = vpack.c.bf16 %v320_v56, %v320_v56 }
  0xfa   :  { %766 = vmatmul.mubr.msk.bf16.gmra.mxu0 %vm367_vm1, %v327_v57  ;;  %v698_v57 = vld [vmem:[%s1200_s6] ss:$0 sm:$0xff]  ;;  %s902_s6 = smov [#allocation2]  }
  0xfb   :  { %785 = vmatprep.mubr.msk.bf16.mxu0 %vm901_vm0, %v899_v4  ;;  %s674_s29 = sshll.u32 %s902_s6, 4  ;;  %s675_s29 = int_to_ptr.vmem [resolvable:$true] %s674_s29 }
  0xfc   :  { %s875_s30 = scalar_lea.vmem %s675_s29, 1664  ;;  %p880_p1 = scmp.lt.s32.totalorder %s675_s29, %s675_s29 }
  0xfd   :  { %p876_p0 = scmp.ne.s32.totalorder %s675_s29, %s875_s30  ;;  %p881_p2 = scmp.lt.s32.totalorder %s875_s30, %s875_s30 }
  0xff   :  { %p882_p3 = por %p881_p2, %p880_p1 }
 0x101   :  { %p883_p4 = pnand %p882_p3, %p876_p0 }
 0x153   :  { %v423_v32 = vpop.f32.mrf.mxu0 }
 0x154   :  { %v424_v58 = vadd.f32 %v1163_v31, %v423_v32 }
 0x155   :  { %v743_v33 = vpop.f32.mrf.mxu0 }
 0x156   :  { %v477_v62 = vmax.f32 %v424_v58, 0.0 }
 0x157   :  { %v426_v59 = vpop.f32.mrf.mxu0 }
 0x158   :  { %v427_v60 = vadd.f32 %v1163_v31, %v426_v59 }
 0x159   :  { %v744_v47 = vpop.f32.mrf.mxu0 }
 0x15a   :  { %v478_v63 = vmax.f32 %v427_v60, 0.0 }
 0x15c   :  { %v490_v0 = vpack.c.bf16 %v478_v63, %v477_v62 }
 0x15e   :  { %786 = vmatmul.mubr.bf16.vlgmr.msra.gmra.mxu0 %v490_v0 }
 0x164   :  { %v431_v1 = vpop.f32.mrf.mxu0 }
 0x165   :  { %v432_v2 = vadd.f32 %v1163_v31, %v431_v1 }
 0x166   :  { %v747_v61 = vpop.f32.mrf.mxu0 }
 0x167   :  { %v479_v7 = vmax.f32 %v432_v2, 0.0 }
 0x168   :  { %v434_v3 = vpop.f32.mrf.mxu0 }
 0x169   :  { %v435_v5 = vadd.f32 %v1163_v31, %v434_v3 }
 0x16a   :  { %v748_v6 = vpop.f32.mrf.mxu0 }
 0x16b   :  { %v480_v8 = vmax.f32 %v435_v5, 0.0 }
 0x16d   :  { %v491_v9 = vpack.c.bf16 %v480_v8, %v479_v7 }
 0x16f   :  { %790 = vmatmul.mubr.bf16.vlgmr.msra.gmra.mxu1 %v491_v9 }
 0x170   :  { %793 = vmatprep.mubr.msk.bf16.mxu1 %vm901_vm0, %v899_v4 }
 0x177   :  { %v439_v10 = vpop.f32.mrf.mxu0 }
 0x178   :  { %v440_v12 = vadd.f32 %v1163_v31, %v439_v10 }
 0x179   :  { %v751_v11 = vpop.f32.mrf.mxu0 }
 0x17a   :  { %v481_v16 = vmax.f32 %v440_v12, 0.0 }
 0x17b   :  { %v442_v13 = vpop.f32.mrf.mxu0 }
 0x17c   :  { %v443_v14 = vadd.f32 %v1163_v31, %v442_v13 }
 0x17d   :  { %v752_v15 = vpop.f32.mrf.mxu0 }
 0x17e   :  { %v482_v17 = vmax.f32 %v443_v14, 0.0 }
 0x180   :  { %v492_v18 = vpack.c.bf16 %v482_v17, %v481_v16 }
 0x182   :  { %794 = vmatmul.mubr.bf16.gmra.mxu1 %v492_v18 }
 0x183   :  { %797 = vmatprep.mubr.msk.bf16.mxu1 %vm901_vm0, %v899_v4 }
 0x18a   :  { %v447_v19 = vpop.f32.mrf.mxu0 }
 0x18b   :  { %v448_v21 = vadd.f32 %v1163_v31, %v447_v19 }
 0x18c   :  { %v755_v20 = vpop.f32.mrf.mxu0 }
 0x18d   :  { %v483_v25 = vmax.f32 %v448_v21, 0.0 }
 0x18e   :  { %v450_v22 = vpop.f32.mrf.mxu0 }
 0x18f   :  { %v451_v23 = vadd.f32 %v1163_v31, %v450_v22 }
 0x190   :  { %v756_v24 = vpop.f32.mrf.mxu0 }
 0x191   :  { %v484_v26 = vmax.f32 %v451_v23, 0.0 }
 0x193   :  { %v493_v27 = vpack.c.bf16 %v484_v26, %v483_v25 }
 0x195   :  { %798 = vmatmul.mubr.bf16.gmra.mxu1 %v493_v27 }
 0x196   :  { %801 = vmatprep.mubr.msk.bf16.mxu1 %vm901_vm0, %v899_v4 }
 0x19d   :  { %v455_v28 = vpop.f32.mrf.mxu0 }
 0x19e   :  { %v456_v30 = vadd.f32 %v1163_v31, %v455_v28 }
 0x19f   :  { %v759_v29 = vpop.f32.mrf.mxu0 }
 0x1a0   :  { %v485_v37 = vmax.f32 %v456_v30, 0.0 }
 0x1a1   :  { %v458_v34 = vpop.f32.mrf.mxu0 }
 0x1a2   :  { %v459_v35 = vadd.f32 %v1163_v31, %v458_v34 }
 0x1a3   :  { %v760_v36 = vpop.f32.mrf.mxu0 }
 0x1a4   :  { %v486_v38 = vmax.f32 %v459_v35, 0.0 }
 0x1a6   :  { %v494_v39 = vpack.c.bf16 %v486_v38, %v485_v37 }
 0x1a8   :  { %802 = vmatmul.mubr.bf16.gmra.mxu1 %v494_v39 }
 0x1a9   :  { %805 = vmatprep.mubr.msk.bf16.mxu1 %vm901_vm0, %v899_v4 }
 0x1b0   :  { %v463_v40 = vpop.f32.mrf.mxu0 }
 0x1b1   :  { %v464_v42 = vadd.f32 %v1163_v31, %v463_v40 }
 0x1b2   :  { %v763_v41 = vpop.f32.mrf.mxu0 }
 0x1b3   :  { %v487_v46 = vmax.f32 %v464_v42, 0.0 }
 0x1b4   :  { %v466_v43 = vpop.f32.mrf.mxu0 }
 0x1b5   :  { %v467_v44 = vadd.f32 %v1163_v31, %v466_v43 }
 0x1b6   :  { %v764_v45 = vpop.f32.mrf.mxu0 }
 0x1b7   :  { %v488_v48 = vmax.f32 %v467_v44, 0.0 }
 0x1b9   :  { %v495_v49 = vpack.c.bf16 %v488_v48, %v487_v46 }
 0x1ba   :  { %v471_v50 = vpop.f32.mrf.mxu0 }
 0x1bb   :  { %v472_v51 = vadd.f32 %v1163_v31, %v471_v50  ;;  %806 = vmatmul.mubr.bf16.gmra.mxu1 %v495_v49 }
 0x1bc   :  { %v767_v52 = vpop.f32.mrf.mxu0  ;;  %809 = vmatprep.mubr.msk.bf16.mxu1 %vm901_vm0, %v899_v4 }
 0x1bd   :  { %v489_v53 = vmax.f32 %v472_v51, 0.0 }
 0x1be   :  { %v474_v54 = vpop.f32.mrf.mxu0 }
 0x1bf   :  { %v496_v56 = vpack.c.bf16 %v489_v53, %v489_v53 }
 0x1c0   :  { %v768_v55 = vpop.f32.mrf.mxu0 }
 0x1c3   :  { %810 = vmatmul.mubr.bf16.gmra.mxu1 %v496_v56 }
 0x21e   :  { %v602_v32 = vpop.f32.mrf.mxu0 }
 0x21f   :  { %v603_v33 = vadd.f32 %v698_v57, %v602_v32 }
 0x220   :  { %v787_v58 = vpop.f32.mrf.mxu0 }
 0x221   :  { %656 = vst [vmem:[#allocation2] sm:$0xff] %v603_v33 }
 0x222   :  { %v605_v59 = vpop.f32.mrf.mxu0 }
 0x223   :  { %v606_v31 = vadd.f32 %v698_v57, %v605_v59 }
 0x224   :  { %v788_v60 = vpop.f32.mrf.mxu0 }
 0x225   :  { %657 = vst [vmem:[#allocation2 + $0x8] sm:$0xff] %v606_v31 }
 0x22f   :  { %v610_v47 = vpop.f32.mrf.mxu1 }
 0x230   :  { %v611_v62 = vadd.f32 %v698_v57, %v610_v47 }
 0x231   :  { %v791_v4 = vpop.f32.mrf.mxu1 }
 0x232   :  { %658 = vst [vmem:[#allocation2 + $0x10] sm:$0xff] %v611_v62 }
 0x233   :  { %v613_v63 = vpop.f32.mrf.mxu1 }
 0x234   :  { %v614_v0 = vadd.f32 %v698_v57, %v613_v63 }
 0x235   :  { %v792_v1 = vpop.f32.mrf.mxu1 }
 0x236   :  { %659 = vst [vmem:[#allocation2 + $0x18] sm:$0xff] %v614_v0 }
 0x242   :  { %v618_v61 = vpop.f32.mrf.mxu1 }
 0x243   :  { %v619_v2 = vadd.f32 %v698_v57, %v618_v61 }
 0x244   :  { %v795_v3 = vpop.f32.mrf.mxu1 }
 0x245   :  { %660 = vst [vmem:[#allocation2 + $0x20] sm:$0xff] %v619_v2 }
 0x246   :  { %v621_v5 = vpop.f32.mrf.mxu1 }
 0x247   :  { %v622_v6 = vadd.f32 %v698_v57, %v621_v5 }
 0x248   :  { %v796_v7 = vpop.f32.mrf.mxu1 }
 0x249   :  { %661 = vst [vmem:[#allocation2 + $0x28] sm:$0xff] %v622_v6 }
 0x255   :  { %v626_v8 = vpop.f32.mrf.mxu1 }
 0x256   :  { %v627_v9 = vadd.f32 %v698_v57, %v626_v8 }
 0x257   :  { %v799_v10 = vpop.f32.mrf.mxu1 }
 0x258   :  { %662 = vst [vmem:[#allocation2 + $0x30] sm:$0xff] %v627_v9 }
 0x259   :  { %v629_v11 = vpop.f32.mrf.mxu1 }
 0x25a   :  { %v630_v12 = vadd.f32 %v698_v57, %v629_v11 }
 0x25b   :  { %v800_v13 = vpop.f32.mrf.mxu1 }
 0x25c   :  { %663 = vst [vmem:[#allocation2 + $0x38] sm:$0xff] %v630_v12 }
 0x268   :  { %v634_v14 = vpop.f32.mrf.mxu1 }
 0x269   :  { %v635_v15 = vadd.f32 %v698_v57, %v634_v14 }
 0x26a   :  { %v803_v16 = vpop.f32.mrf.mxu1 }
 0x26b   :  { %664 = vst [vmem:[#allocation2 + $0x40] sm:$0xff] %v635_v15 }
 0x26c   :  { %v637_v17 = vpop.f32.mrf.mxu1 }
 0x26d   :  { %v638_v18 = vadd.f32 %v698_v57, %v637_v17 }
 0x26e   :  { %v804_v19 = vpop.f32.mrf.mxu1 }
 0x26f   :  { %665 = vst [vmem:[#allocation2 + $0x48] sm:$0xff] %v638_v18 }
 0x27b   :  { %v642_v20 = vpop.f32.mrf.mxu1 }
 0x27c   :  { %v643_v21 = vadd.f32 %v698_v57, %v642_v20 }
 0x27d   :  { %v807_v22 = vpop.f32.mrf.mxu1 }
 0x27e   :  { %666 = vst [vmem:[#allocation2 + $0x50] sm:$0xff] %v643_v21 }
 0x27f   :  { %v645_v23 = vpop.f32.mrf.mxu1 }
 0x280   :  { %v646_v24 = vadd.f32 %v698_v57, %v645_v23 }
 0x281   :  { %v808_v25 = vpop.f32.mrf.mxu1 }
 0x282   :  { %667 = vst [vmem:[#allocation2 + $0x58] sm:$0xff] %v646_v24 }
 0x283   :  { %v650_v26 = vpop.f32.mrf.mxu1 }
 0x284   :  { %v651_v27 = vadd.f32 %v698_v57, %v650_v26 }
 0x285   :  { %v811_v28 = vpop.f32.mrf.mxu1 }
 0x286   :  { %668 = vst [vmem:[#allocation2 + $0x60] sm:$0xff] %v651_v27 }
 0x287   :  { %v653_v29 = vpop.f32.mrf.mxu1 }
 0x288   :  { %886 = shalt.err (!%p883_p4)
}
 0x289   :  { %s903_s8 = smov 128   ;;  %s904_s9 = smov 8   ;;  %v812_v30 = vpop.f32.mrf.mxu1 }
 0x28a   :  { %680 = dma.vmem_to_hbm [thread:$0]  %s675_s29, 1664, %s1201_s7, [#allocation3], %s903_s8, %s903_s8, %s904_s9  }
 0x28b   :  { %895 = dma.done.wait [#allocation3], 1664  }
 0x28c   :  { %896 = vsyncadd [#allocation3], 4294965632 }
 0x28d   :  { %684 = vsyncpa [#allocation3], 1 }

</bundles_post_ra>
